<compile_context>
chip_gen: v6e
topology: v6e:2x2x1
jax: 0.10.0
libtpu: 0.0.40
codegen_flags: <defaults>
</compile_context>

<pallas_src>
import math

import jax
import jax.numpy as jnp
import numpy as np
from jax.experimental import pallas as pl
from jax.experimental.pallas import tpu as pltpu


# ----------------------------- Pallas kernel --------------------------------
def times_embed_kernel(x_ref, codes_ref, wfold_ref, table_ref, pe_mean_ref,
                       out_ref):
    GB = x_ref.shape[0]
    D = codes_ref.shape[1]
    S = table_ref.shape[0]                      # 7 + 32 + 13 concat table rows

    # --- TokenEmbedding (circular Conv1d k=3) folded through sum over D:
    #     xflat (GB, D*F) @ Wfold (D*F, E) == sum_d conv(feat)[d]
    #     (Wfold has zero rows for the 3 temporal-code lanes).
    conv_sum = jnp.dot(x_ref[...].astype(jnp.bfloat16), wfold_ref[...],
                       preferred_element_type=jnp.float32)            # (GB, E)

    # --- TemporalEmbedding: 3 fixed-table gathers fused into one matmul.
    #     counts[g, s] = #{(d, c) : code[g, d, c] + offset[c] == s}  (exact ints)
    #     counts @ concat_table == sum_d temporal_emb[d].
    codes = codes_ref[...]                                             # (GB, D, 3) i32
    iota = jax.lax.broadcasted_iota(jnp.int32, (GB, D, S), 2)
    counts = jnp.sum((codes[..., 0:1] == iota).astype(jnp.int32), axis=1)
    counts = counts + jnp.sum((codes[..., 1:2] == iota).astype(jnp.int32), axis=1)
    counts = counts + jnp.sum((codes[..., 2:3] == iota).astype(jnp.int32), axis=1)
    temporal_sum = jnp.dot(counts.astype(jnp.bfloat16), table_ref[...],
                           preferred_element_type=jnp.float32)         # (GB, E)

    # --- mean over D applied once in f32, + constant mean positional row.
    out_ref[...] = (conv_sum + temporal_sum) * (1.0 / D) + pe_mean_ref[...]


# ------------------------------ JAX wrapper ----------------------------------
def times_embed_forward(x, conv_w, wd_tbl, day_tbl, mon_tbl, pe_full,
                        temporal_dim=3, gb=None,
                        vmem_limit_bytes=48 * 1024 * 1024):
    B, C, N, D, F = x.shape
    E = conv_w.shape[0]
    Fd = F - temporal_dim
    G = B * C * N
    DF = D * F

    # Sequences per grid step: large, sublane-aligned tiles; keep >= 2 grid
    # steps when possible so both v7x TensorCores get work under "parallel".
    if gb is None:
        gb = 1024 if G > 1024 else max(8, -(-G // 2))
    gb = max(8, -(-gb // 8) * 8)
    gb = min(gb, max(8, -(-G // 8) * 8))
    Gp = -(-G // gb) * gb

    # Lane-dense input slab (G, D*F): pure reshape, no slicing / casting pass.
    xf = x.reshape(G, DF).astype(jnp.float32)
    # Temporal codes as a separate tiny int32 input, table offsets pre-added.
    offs = jnp.asarray([0, wd_tbl.shape[0], wd_tbl.shape[0] + day_tbl.shape[0]],
                       dtype=jnp.int32)
    codes = x.reshape(G, D, F)[..., Fd:].astype(jnp.int32) + offs      # (G, D, 3)
    if Gp != G:
        xf = jnp.pad(xf, ((0, Gp - G), (0, 0)))
        codes = jnp.pad(codes, ((0, Gp - G), (0, 0), (0, 0)))

    # Conv weight (E, Fd, 3) folded through sum over taps AND over D:
    #   Wfold[d*F + f, e] = sum_k conv_w[e, f, k]   (zero rows for code lanes)
    w_sum = jnp.transpose(jnp.sum(conv_w, axis=2), (1, 0))             # (Fd, E)
    w_sum = jnp.pad(w_sum, ((0, temporal_dim), (0, 0)))                # (F, E)
    w_fold = jnp.tile(w_sum, (D, 1)).astype(jnp.bfloat16)              # (D*F, E)

    # Concatenated fixed sinusoidal tables; constant mean-over-D positional row.
    table = jnp.concatenate([wd_tbl, day_tbl, mon_tbl], 0).astype(jnp.bfloat16)
    pe_mean = jnp.mean(pe_full[:D], axis=0, keepdims=True).astype(jnp.float32)

    out = pl.pallas_call(
        times_embed_kernel,
        out_shape=jax.ShapeDtypeStruct((Gp, E), jnp.float32),
        grid_spec=pltpu.PrefetchScalarGridSpec(
            num_scalar_prefetch=0,
            grid=(Gp // gb,),
            in_specs=[
                pl.BlockSpec((gb, DF), lambda g: (g, 0)),
                pl.BlockSpec((gb, D, 3), lambda g: (g, 0, 0)),
                pl.BlockSpec((DF, E), lambda g: (0, 0)),
                pl.BlockSpec((table.shape[0], E), lambda g: (0, 0)),
                pl.BlockSpec((1, E), lambda g: (0, 0)),
            ],
            out_specs=pl.BlockSpec((gb, E), lambda g: (g, 0)),
        ),
        compiler_params=pltpu.CompilerParams(
            dimension_semantics=("parallel",),
            vmem_limit_bytes=vmem_limit_bytes),
    )(xf, codes, w_fold, table, pe_mean)

    out = out[:G].reshape(B, C, N, E)                 # == x.mean(dim=-2)
    if out.shape[1] == 1:                             # torch .squeeze(1)
        out = jnp.squeeze(out, axis=1)
    return out


# --------------------------- parameter construction --------------------------
def sinusoidal_table(rows, embed_dim):
    position = np.arange(rows, dtype=np.float32)[:, None]
    div_term = np.exp(np.arange(0, embed_dim, 2, dtype=np.float32)
                      * -(math.log(10000.0) / embed_dim))
    tbl = np.zeros((rows, embed_dim), dtype=np.float32)
    tbl[:, 0::2] = np.sin(position * div_term)
    tbl[:, 1::2] = np.cos(position * div_term)
    return jnp.asarray(tbl)


# ------------------------------ pure-JAX reference ---------------------------
def times_embed_reference(x, conv_w, wd_tbl, day_tbl, mon_tbl, pe_full,
                          temporal_dim=3):
    B, C, N, D, F = x.shape
    Fd = F - temporal_dim
    xf = x.reshape(B * C * N, D, F)
    feature = xf[..., :Fd]
    temporal = xf[..., Fd:].astype(jnp.int32)

    f = jnp.transpose(feature, (0, 2, 1))                       # (G, Fd, D)
    fpad = jnp.concatenate([f[..., -1:], f, f[..., :1]], axis=-1)
    taps = jnp.stack([fpad[..., k:k + D] for k in range(3)], axis=-1)
    val = jnp.einsum('gcdk,eck->gde', taps, conv_w)             # (G, D, E)

    temp_emb = (wd_tbl[temporal[..., 0]] + day_tbl[temporal[..., 1]]
                + mon_tbl[temporal[..., 2]])                    # (G, D, E)
    total = val + temp_emb + pe_full[:D][None]
    out = total.reshape(B, C, N, D, -1).mean(axis=-2)
    if out.shape[1] == 1:
        out = jnp.squeeze(out, axis=1)
    return out


# ------------------------------------ main -----------------------------------
if __name__ == "__main__":
    B, C, N, D = 2, 1, 8, 8
    input_dim, temporal_dim, embed_dim = 16, 3, 128
    Fd = input_dim - temporal_dim

    key = jax.random.PRNGKey(0)
    k1, k2, k3, k4, k5 = jax.random.split(key, 5)

    # input x: last `temporal_dim` features are integer time codes stored as f32
    feature_part = jax.random.normal(k1, (B, C, N, D, Fd), dtype=jnp.float32)
    weekday = jax.random.randint(k2, (B, C, N, D, 1), 0, 7)
    day = jax.random.randint(k3, (B, C, N, D, 1), 0, 32)
    month = jax.random.randint(k4, (B, C, N, D, 1), 0, 13)
    temporal_part = jnp.concatenate([weekday, day, month], -1).astype(jnp.float32)
    x = jnp.concatenate([feature_part, temporal_part], axis=-1)   # (B,C,N,D,F)

    # TokenEmbedding conv weight: kaiming_normal_(fan_in, leaky_relu)
    fan_in = Fd * 3
    gain = math.sqrt(2.0 / (1.0 + 0.01 ** 2))
    std = gain / math.sqrt(fan_in)
    conv_w = std * jax.random.normal(k5, (embed_dim, Fd, 3), dtype=jnp.float32)

    # Fixed sinusoidal tables (TemporalEmbedding / PositionalEmbedding buffers)
    wd_tbl = sinusoidal_table(7, embed_dim)
    day_tbl = sinusoidal_table(32, embed_dim)
    mon_tbl = sinusoidal_table(13, embed_dim)
    pe_full = sinusoidal_table(5000, embed_dim)

    # gb=8 -> 2 grid steps at this tiny demo size (exercises pipelining /
    # megacore sharding); at real sizes gb defaults to 1024 sequences per step.
    out = times_embed_forward(x, conv_w, wd_tbl, day_tbl, mon_tbl, pe_full,
                              temporal_dim=temporal_dim, gb=8)
    out = jax.block_until_ready(out)

    ref = times_embed_reference(x, conv_w, wd_tbl, day_tbl, mon_tbl, pe_full,
                                temporal_dim=temporal_dim)
    np.testing.assert_allclose(np.asarray(out), np.asarray(ref),
                               rtol=2e-2, atol=2e-2)
    assert out.shape == (B, N, embed_dim)
    print("KERNEL_OK")
</pallas_src>

<mosaic_0001>
module attributes {stable_mosaic.version = 11 : i64} {
  func.func @times_embed_kernel(%arg0: i32, %arg1: memref<8x128xf32, #tpu.memory_space<vmem>>, %arg2: memref<8x8x3xi32, #tpu.memory_space<vmem>>, %arg3: memref<128x128xbf16, #tpu.memory_space<vmem>>, %arg4: memref<52x128xbf16, #tpu.memory_space<vmem>>, %arg5: memref<1x128xf32, #tpu.memory_space<vmem>>, %arg6: memref<8x128xf32, #tpu.memory_space<vmem>>) attributes {dimension_semantics = [#tpu.dimension_semantics<parallel>], iteration_bounds = array<i64: 2>, scalar_prefetch = 0 : i64, scratch_operands = 0 : i64, tpu.core_type = #tpu.core_type<tc>, window_params = [{transform_indices = @transform_0, window_bounds = array<i64: 8, 128>}, {transform_indices = @transform_1, window_bounds = array<i64: 8, 8, 3>}, {pipeline_mode = #tpu.pipeline_mode<synchronous>, transform_indices = @transform_2, window_bounds = array<i64: 128, 128>}, {pipeline_mode = #tpu.pipeline_mode<synchronous>, transform_indices = @transform_3, window_bounds = array<i64: 52, 128>}, {pipeline_mode = #tpu.pipeline_mode<synchronous>, transform_indices = @transform_4, window_bounds = array<i64: 1, 128>}, {transform_indices = @transform_5, window_bounds = array<i64: 8, 128>}]} {
    %c0 = arith.constant 0 : index
    %c0_0 = arith.constant 0 : index
    %0 = vector.load %arg1[%c0, %c0_0] : memref<8x128xf32, #tpu.memory_space<vmem>>, vector<8x128xf32>
    %1 = arith.truncf %0 : vector<8x128xf32> to vector<8x128xbf16>
    %c0_1 = arith.constant 0 : index
    %c0_2 = arith.constant 0 : index
    %2 = vector.load %arg3[%c0_1, %c0_2] : memref<128x128xbf16, #tpu.memory_space<vmem>>, vector<128x128xbf16>
    %cst = arith.constant dense<0.000000e+00> : vector<8x128xf32>
    %3 = tpu.matmul %1, %2, %cst {dimension_numbers = #tpu.dot_dimension_numbers<[1], [0], [0], [1], [0, 0, 1, 1], [], []>} : vector<8x128xbf16>, vector<128x128xbf16>, vector<8x128xf32> -> vector<8x128xf32>
    %c0_3 = arith.constant 0 : index
    %c0_4 = arith.constant 0 : index
    %c0_5 = arith.constant 0 : index
    %4 = vector.load %arg2[%c0_3, %c0_4, %c0_5] : memref<8x8x3xi32, #tpu.memory_space<vmem>>, vector<8x8x3xi32>
    %5 = tpu.iota {dimensions = array<i32: 2>} : vector<8x8x52xi32>
    %6 = vector.extract_strided_slice %4 {offsets = [0, 0, 0], sizes = [8, 8, 1], strides = [1, 1, 1]} : vector<8x8x3xi32> to vector<8x8x1xi32>
    %7 = vector.broadcast %6 : vector<8x8x1xi32> to vector<8x8x52xi32>
    %8 = arith.cmpi eq, %7, %5 : vector<8x8x52xi32>
    %9 = arith.extui %8 : vector<8x8x52xi1> to vector<8x8x52xi32>
    %cst_6 = arith.constant dense<0> : vector<8x52xi32>
    %10 = vector.multi_reduction <add>, %9, %cst_6 [1] : vector<8x8x52xi32> to vector<8x52xi32>
    %11 = vector.extract_strided_slice %4 {offsets = [0, 0, 1], sizes = [8, 8, 1], strides = [1, 1, 1]} : vector<8x8x3xi32> to vector<8x8x1xi32>
    %12 = vector.broadcast %11 : vector<8x8x1xi32> to vector<8x8x52xi32>
    %13 = arith.cmpi eq, %12, %5 : vector<8x8x52xi32>
    %14 = arith.extui %13 : vector<8x8x52xi1> to vector<8x8x52xi32>
    %cst_7 = arith.constant dense<0> : vector<8x52xi32>
    %15 = vector.multi_reduction <add>, %14, %cst_7 [1] : vector<8x8x52xi32> to vector<8x52xi32>
    %16 = arith.addi %10, %15 : vector<8x52xi32>
    %17 = vector.extract_strided_slice %4 {offsets = [0, 0, 2], sizes = [8, 8, 1], strides = [1, 1, 1]} : vector<8x8x3xi32> to vector<8x8x1xi32>
    %18 = vector.broadcast %17 : vector<8x8x1xi32> to vector<8x8x52xi32>
    %19 = arith.cmpi eq, %18, %5 : vector<8x8x52xi32>
    %20 = arith.extui %19 : vector<8x8x52xi1> to vector<8x8x52xi32>
    %cst_8 = arith.constant dense<0> : vector<8x52xi32>
    %21 = vector.multi_reduction <add>, %20, %cst_8 [1] : vector<8x8x52xi32> to vector<8x52xi32>
    %22 = arith.addi %16, %21 : vector<8x52xi32>
    %23 = arith.sitofp %22 : vector<8x52xi32> to vector<8x52xbf16>
    %c0_9 = arith.constant 0 : index
    %c0_10 = arith.constant 0 : index
    %24 = vector.load %arg4[%c0_9, %c0_10] : memref<52x128xbf16, #tpu.memory_space<vmem>>, vector<52x128xbf16>
    %cst_11 = arith.constant dense<0.000000e+00> : vector<8x128xf32>
    %25 = tpu.matmul %23, %24, %cst_11 {dimension_numbers = #tpu.dot_dimension_numbers<[1], [0], [0], [1], [0, 0, 1, 1], [], []>} : vector<8x52xbf16>, vector<52x128xbf16>, vector<8x128xf32> -> vector<8x128xf32>
    %26 = arith.addf %3, %25 : vector<8x128xf32>
    %cst_12 = arith.constant 1.250000e-01 : f32
    %27 = vector.broadcast %cst_12 : f32 to vector<8x128xf32>
    %28 = arith.mulf %26, %27 : vector<8x128xf32>
    %c0_13 = arith.constant 0 : index
    %c0_14 = arith.constant 0 : index
    %29 = vector.load %arg5[%c0_13, %c0_14] : memref<1x128xf32, #tpu.memory_space<vmem>>, vector<1x128xf32>
    %30 = vector.broadcast %29 : vector<1x128xf32> to vector<8x128xf32>
    %31 = arith.addf %28, %30 : vector<8x128xf32>
    %c0_15 = arith.constant 0 : index
    %c0_16 = arith.constant 0 : index
    %32 = vector.load %arg6[%c0_15, %c0_16] : memref<8x128xf32, #tpu.memory_space<vmem>>, vector<8x128xf32>
    tpu.vector_store %arg6[%c0_15, %c0_16], %31 {strides = array<i32>} : memref<8x128xf32, #tpu.memory_space<vmem>>, vector<8x128xf32>,
    return
  }
  func.func @transform_0(%arg0: i32) -> (i32, i32) {
    %c0_i32 = arith.constant 0 : i32
    %c0_i32_0 = arith.constant 0 : i32
    return %arg0, %c0_i32 : i32, i32
  }
  func.func @transform_1(%arg0: i32) -> (i32, i32, i32) {
    %c0_i32 = arith.constant 0 : i32
    %c0_i32_0 = arith.constant 0 : i32
    %c0_i32_1 = arith.constant 0 : i32
    return %arg0, %c0_i32, %c0_i32_0 : i32, i32, i32
  }
  func.func @transform_2(%arg0: i32) -> (i32, i32) {
    %c0_i32 = arith.constant 0 : i32
    %c0_i32_0 = arith.constant 0 : i32
    %c0_i32_1 = arith.constant 0 : i32
    return %c0_i32, %c0_i32_0 : i32, i32
  }
  func.func @transform_3(%arg0: i32) -> (i32, i32) {
    %c0_i32 = arith.constant 0 : i32
    %c0_i32_0 = arith.constant 0 : i32
    %c0_i32_1 = arith.constant 0 : i32
    return %c0_i32, %c0_i32_0 : i32, i32
  }
  func.func @transform_4(%arg0: i32) -> (i32, i32) {
    %c0_i32 = arith.constant 0 : i32
    %c0_i32_0 = arith.constant 0 : i32
    %c0_i32_1 = arith.constant 0 : i32
    return %c0_i32, %c0_i32_0 : i32, i32
  }
  func.func @transform_5(%arg0: i32) -> (i32, i32) {
    %c0_i32 = arith.constant 0 : i32
    %c0_i32_0 = arith.constant 0 : i32
    return %arg0, %c0_i32 : i32, i32
  }
}

</mosaic_0001>

<bundles_post_ra>
// kernel: tpu_custom_call.1
= control target key start
LH: loop header
LB: loop body
LE: loop exit
PB: predicated region body
PF: predicated region fallthrough
CT: control target
= control target key end

     0   :  { %10 = vsyncpa [#allocation3], 0  ;;  %s1352_s0 = inlined_call_operand.vmem [shape: f32[16,128], index: 0, kind: input, shape index: {}]   ;;  %s1353_s1 = inlined_call_operand.vmem [shape: s32[16,8,3], index: 1, kind: input, shape index: {}]   ;;  %s1354_s2 = inlined_call_operand.vmem [shape: bf16[128,128], index: 2, kind: input, shape index: {}]   ;;  %s1355_s3 = inlined_call_operand.vmem [shape: bf16[52,128], index: 3, kind: input, shape index: {}]   ;;  %s1356_s4 = inlined_call_operand.vmem [shape: f32[1,128], index: 4, kind: input, shape index: {}]   ;;  %s1357_s5 = inlined_call_operand.hbm [shape: f32[16,128], index: 5, kind: output, shape index: {}]  }
   0x1   :  { %12 = vsyncpa [#allocation3 + $0x1], 0  ;;  %s1120_s18 = smov 0   ;;  %s1122_s19 = smov 0  }
   0x2   :  { %s1124_s20 = smov 0   ;;  %s1126_s21 = smov 0  }
   0x3 LB: > { %s1141_s22 = sadd.s32 4294967295, %s1082_s21   ;;  %s881_s23 = sadd.s32 4294967294, %s1082_s21   ;;  %s1082_s21 = sphi %s1126_s21, %s1363_s21   ;;  %s1078_s20 = sphi %s1124_s20, %s1362_s20   ;;  %s1074_s19 = sphi %s1122_s19, %s1361_s19   ;;  %s1070_s18 = sphi %s1120_s18, %s1360_s18  }
   0x4   : > { %s1145_s24 = sadd.s32 1, %s1082_s21   ;;  %s140_s25 = sadd.s32 1, %s1078_s20 }
   0x5   : > { %s137_s26 = ssub.s32 %s1082_s21, %s1145_s24  ;;  %p150_p0 = scmp.ne.s32.totalorder %s1078_s20, %s1074_s19 }
   0x6   : > { %p138_p1 = scmp.eq.s32.totalorder %s137_s26, 0  ;;  %p151_p2 = scmp.eq.s32.totalorder %s1141_s22, 1 }
   0x7   : > { %p156_p3 = scmp.ne.s32.totalorder %s1074_s19, %s1070_s18  ;;  %p157_p4 = scmp.eq.s32.totalorder %s881_s23, 1 }
   0x8   : > { %s1156_s27 = scalar_select %p138_p1, %s1078_s20, %s140_s25  }
   0x9   : > { %p1158_p5 = por %p151_p2, %p150_p0  ;;  %p1162_p6 = por %p157_p4, %p156_p3 }
   0xa   : > { %p884_p7 = scmp.ge.s32.totalorder %s1082_s21, 1  ;;  %p200_p8 = scmp.lt.s32.totalorder %s1082_s21, 3 }
   0xc   : > { %p201_p9 = pnand %p884_p7, %p200_p8 }
   0xd   : > { %s887_s30 = sshll.u32 (!%p201_p9), %s1141_s22, 3  ;;  %p232_p11 = scmp.lt.s32.totalorder (!%p201_p9), %s1141_s22, 1 }
   0xe   : > { %204 = sbr.rel (%p201_p9) target bundleno = 447 (0x1bf), region = 40  ;;  %p237_p10 = scmp.lt.s32.totalorder (!%p201_p9), %s887_s30, 15 }
   0xf   : > { %s229_s7 = sand.u32 (!%p201_p9), 1, %s1074_s19   ;;  %s904_s11 = sshll.u32 (!%p201_p9), %s1141_s22, 7 }
  0x10   : > { %s885_s8 = sshll.u32 (!%p201_p9), %s229_s7, 3  ;;  %s1317_s16 = scalar_lea.hbm (!%p201_p9), %s1357_s5, %s904_s11 }
  0x11   : > { %s797_s17 = scalar_lea.sflag (!%p201_p9), [#allocation3], %s229_s7 }
  0x13   : > { %v1084_v0 = vmov 1   ;;  %s1365_s30 = smov (!%p237_p10, %s887_s30), 15  ;;  %v1085_v6 = vmov 0   ;;  %v1086_v8 = vmov 2   ;;  %v1010_v11 = vld [vmem:[%s1354_s2 + $0x38] sm:$0xff]   ;;  %v1087_v12 = vmov 0.0  }
  0x14   : > { %1000 = vset.pattern.permute.xlu0 %v1084_v0  ;;  %997 = vset.pattern.permute.xlu1 %v1084_v0  ;;  %s888_s6 = sshll.u32 %s1365_s30, 3  ;;  %v1011_v13 = vld [vmem:[%s1354_s2 + $0x30] sm:$0xff]   ;;  %v1012_v14 = vld [vmem:[%s1354_s2 + $0x28] sm:$0xff]   ;;  %v1013_v15 = vld [vmem:[%s1354_s2 + $0x20] sm:$0xff]   ;;  %vm654_vm0 = vcmask 1041408   ;;  %vm1088_vm1 = vmmov 0   ;;  %v269_v27 = vlaneseq }
  0x15   : > { %s240_s9 = scalar_lea.vmem %s1353_s1, %s888_s6  ;;  %933 = vmatprep.subr.bf16.mxu1 %v1087_v12  ;;  %921 = vmatprep.subr.bf16.mxu0 %v1087_v12  ;;  %v1014_v16 = vld [vmem:[%s1354_s2 + $0x18] sm:$0xff]   ;;  %v1015_v17 = vld [vmem:[%s1354_s2 + $0x10] sm:$0xff]   ;;  %v1017_v20 = vld [vmem:[%s1354_s2 + $0x8] sm:$0xff]   ;;  %vm311_vm4 = vcmask 424960  }
  0x16   : > { %v265_v1 = vld [vmem:[%s240_s9 + $0x20] sm:$0xff]  ;;  %v266_v3 = vld [vmem:[%s240_s9 + $0x28] sm:$0xff]  ;;  %v263_v5 = vld [vmem:[%s240_s9 + $0x10] sm:$0xff]  ;;  %934 = vmatpush3.bf16.msra.mxu1 %v1010_v11  ;;  %s233_s12 = scalar_select %p232_p11, %s1141_s22, 1  ;;  %949 = vmatprep.mubr.msk.bf16.mxu1 %vm1088_vm1, %v1087_v12  ;;  %v1216_v28 = vand.u32 127, %v269_v27 }
  0x17   : > { %v261_v2 = vld [vmem:[%s240_s9] sm:$0xff]  ;;  %381 = vperm.xlu0 %1000, %v265_v1   ;;  %v262_v4 = vld [vmem:[%s240_s9 + $0x8] sm:$0xff]  ;;  %v264_v7 = vld [vmem:[%s240_s9 + $0x18] sm:$0xff]  ;;  %935 = vmatprep.subr.bf16.mxu1 %v1087_v12  ;;  %s1089_s22 = smov [#allocation2]  }
  0x18   : > { %369 = vperm.xlu1 %997, %v261_v2   ;;  %v267_v9 = vld [vmem:[%s240_s9 + $0x30] sm:$0xff]  ;;  %v268_v10 = vld [vmem:[%s240_s9 + $0x38] sm:$0xff]  ;;  %v1019_v22 = vld [vmem:[%s1354_s2] sm:$0xff]   ;;  %s886_s15 = sshll.u32 %s233_s12, 3  ;;  %929 = vmatprep.mubr.msk.bf16.mxu0 %vm1088_vm1, %v1087_v12  ;;  %s231_s12 = scalar_lea.vmem [#allocation2], %s885_s8 }
  0x19   : > { %v1016_v18 = vld [vmem:[%s1355_s3 + $0x18] ss:$0 sps:$4 sm:$0x33]   ;;  %v1018_v21 = vld [vmem:[%s1355_s3 + $0x10] sm:$0xff]   ;;  %s235_s23 = scalar_lea.vmem %s1352_s0, %s886_s15  ;;  %v1020_v23 = vld [vmem:[%s1355_s3 + $0x8] sm:$0xff]   ;;  %s810_s13 = sshll.u32 %s231_s12, 4  ;;  %s811_s13 = int_to_ptr.vmem [resolvable:$true] %s810_s13 }
  0x1a   : > { %936 = vmatpush3.bf16.msra.mxu1 %v1011_v13  ;;  %v656_v19 = vsel %vm654_vm0, %v1016_v18, 0  ;;  %v243_v24 = vld [vmem:[%s235_s23] sm:$0xff]  ;;  %s1022_s23 = scalar_lea.vmem %s811_s13, 128  ;;  %s1026_s25 = sshll.u32 %s1089_s22, 4  ;;  %s1027_s25 = int_to_ptr.vmem [resolvable:$false] %s1026_s25 }
  0x1b   : > { %384 = vperm.xlu0 %1000, %v266_v3   ;;  %937 = vmatprep.subr.bf16.mxu1 %v1087_v12  ;;  %v244_v25 = vpack.c.bf16 %v243_v24, %v243_v24  ;;  %v1021_v26 = vld [vmem:[%s1355_s3] sm:$0xff]   ;;  %p1023_p12 = scmp.ne.s32.totalorder %s811_s13, %s1022_s23  ;;  %s1028_s26 = scalar_lea.vmem %s1027_s25, 256 }
  0x1c   : > { %372 = vperm.xlu1 %997, %v262_v4   ;;  %922 = vmatpush3.bf16.msra.mxu0 %v656_v19  ;;  %p1029_p1 = scmp.lt.s32.totalorder %s811_s13, %s1027_s25  ;;  %p1030_p2 = scmp.lt.s32.totalorder %s1028_s26, %s1022_s23 }
  0x1d   : > { %923 = vmatprep.subr.bf16.mxu0 %v1087_v12  ;;  %p1024_p13 = pnand %p1023_p12, %p1158_p5 }
  0x1e   : > { %938 = vmatpush3.bf16.msra.mxu1 %v1012_v14  ;;  %p1031_p3 = por %p1030_p2, %p1029_p1 }
  0x1f   : > { %1003 = vset.pattern.permute.xlu0 %v1085_v6  ;;  %939 = vmatprep.subr.bf16.mxu1 %v1087_v12  ;;  %p1025_p0 = pneg %p1024_p13 }
  0x20   : > { %375 = vperm.xlu1 %997, %v263_v5   ;;  %272 = vperm.xlu0 %1003, %v261_v2  }
  0x21   : > { %924 = vmatpush3.bf16.msra.mxu0 %v1018_v21  ;;  %p1032_p4 = pnand %p1031_p3, %p1025_p0 }
  0x22   : > { %940 = vmatpush3.bf16.msra.mxu1 %v1013_v15  ;;  %925 = vmatprep.subr.bf16.mxu0 %v1087_v12 }
  0x23   : > { %941 = vmatprep.subr.bf16.mxu1 %v1087_v12 }
  0x24   : > { %378 = vperm.xlu1 %997, %v264_v7   ;;  %275 = vperm.xlu0 %1003, %v262_v4  }
  0x25   : > { %926 = vmatpush3.bf16.msra.mxu0 %v1020_v23 }
  0x26   : > { %942 = vmatpush3.bf16.msra.mxu1 %v1014_v16  ;;  %927 = vmatprep.subr.bf16.mxu0 %v1087_v12 }
  0x27   : > { %943 = vmatprep.subr.bf16.mxu1 %v1087_v12 }
  0x28   : > { %998 = vset.pattern.permute.xlu1 %v1086_v8  ;;  %278 = vperm.xlu0 %1003, %v263_v5  }
  0x29   : > { %476 = vperm.xlu1 %998, %v262_v4   ;;  %928 = vmatpush3.bf16.msra.mxu0 %v1021_v26 }
  0x2a   : > { %944 = vmatpush3.bf16.msra.mxu1 %v1015_v17 }
  0x2b   : > { %945 = vmatprep.subr.bf16.mxu1 %v1087_v12 }
  0x2c   : > { %281 = vperm.xlu0 %1003, %v264_v7  }
  0x2d   : > { %999 = vset.pattern.permute.xlu1 %v1085_v6 }
  0x2e   : > { %284 = vperm.xlu1 %999, %v265_v1   ;;  %946 = vmatpush3.bf16.msra.mxu1 %v1017_v20 }
  0x2f   : > { %947 = vmatprep.subr.bf16.mxu1 %v1087_v12 }
  0x30   : > { %290 = vperm.xlu0 %1003, %v267_v9  }
  0x32   : > { %1001 = vset.pattern.permute.xlu1 %v1086_v8  ;;  %948 = vmatpush3.bf16.msra.mxu1 %v1019_v22 }
  0x33   : > { %479 = vperm.xlu1 %1001, %v263_v5  }
  0x34   : > { %293 = vperm.xlu0 %1003, %v268_v10  }
  0x35   : > { %950 = vmatmul.mubr.bf16.vlgmr.msra.gmra.mxu1 %v244_v25 }
  0x37   : > { %1002 = vset.pattern.permute.xlu1 %v1085_v6 }
  0x38   : > { %287 = vperm.xlu1 %1002, %v266_v3   ;;  %1007 = vset.pattern.permute.xlu0 %v1086_v8 }
  0x39   : > { %473 = vperm.xlu0 %1007, %v261_v2  }
  0x3c   : > { %1004 = vset.pattern.permute.xlu1 %v1086_v8 }
  0x3d   : > { %482 = vperm.xlu1 %1004, %v264_v7   ;;  %488 = vperm.xlu0 %1007, %v266_v3  }
  0x41   : > { %1005 = vset.pattern.permute.xlu1 %v1084_v0 }
  0x42   : > { %387 = vperm.xlu1 %1005, %v267_v9  }
  0x46   : > { %1006 = vset.pattern.permute.xlu1 %v1086_v8 }
  0x47   : > { %485 = vperm.xlu1 %1006, %v265_v1  }
  0x4b   : > { %1008 = vset.pattern.permute.xlu1 %v1084_v0 }
  0x4c   : > { %390 = vperm.xlu1 %1008, %v268_v10  }
  0x50   : > { %1009 = vset.pattern.permute.xlu1 %v1086_v8 }
  0x51   : > { %491 = vperm.xlu1 %1009, %v267_v9  }
  0x55   : > { %494 = vperm.xlu1 %1009, %v268_v10  }
  0x92   : > { %v382_v30 = vpop.permute.xlu0 %381 }
  0x93   : > { %v370_v29 = vpop.permute.xlu1 %369  ;;  %vm396_vm3 = vcmp.eq.s32.totalorder %v382_v30, %v1216_v28 }
  0x94   : > { %vm392_vm2 = vcmp.eq.s32.totalorder %v370_v29, %v1216_v28  ;;  %v404_v34 = vsel %vm396_vm3, 1, %v1085_v6 }
  0x95   : > { %v400_v33 = vsel %vm392_vm2, 1, %v1085_v6  ;;  %v436_v38 = vsel %vm311_vm4, %v404_v34, 0 }
  0x96   : > { %v385_v32 = vpop.permute.xlu0 %384  ;;  %v408_v36 = vsel %vm311_vm4, %v400_v33, 0  ;;  %v437_v46 = vrot.slane %v436_v38, 4 }
  0x97   : > { %v373_v31 = vpop.permute.xlu1 %372  ;;  %vm397_vm6 = vcmp.eq.s32.totalorder %v385_v32, %v1216_v28  ;;  %v409_v40 = vrot.slane %v408_v36, 4 }
  0x98   : > { %vm393_vm5 = vcmp.eq.s32.totalorder %v373_v31, %v1216_v28  ;;  %v405_v42 = vsel %vm397_vm6, 1, %v1085_v6  ;;  %v438_v59 = vadd.s32 %v437_v46, %v436_v38 }
  0x99   : > { %v401_v39 = vsel %vm393_vm5, 1, %v1085_v6  ;;  %v443_v50 = vsel %vm311_vm4, %v405_v42, 0  ;;  %v410_v53 = vadd.s32 %v409_v40, %v408_v36 }
  0x9a   : > { %v415_v47 = vsel %vm311_vm4, %v401_v39, 0  ;;  %v444_v61 = vrot.slane %v443_v50, 4  ;;  %v439_v13 = vrot.slane %v438_v59, 2 }
  0x9b   : > { %v376_v35 = vpop.permute.xlu1 %375  ;;  %v273_v37 = vpop.permute.xlu0 %272  ;;  %v416_v54 = vrot.slane %v415_v47, 4  ;;  %v411_v3 = vrot.slane %v410_v53, 2 }
  0x9c   : > { %vm394_vm7 = vcmp.eq.s32.totalorder %v376_v35, %v1216_v28  ;;  %vm295_vm8 = vcmp.eq.s32.totalorder %v273_v37, %v1216_v28  ;;  %v445_v9 = vadd.s32 %v444_v61, %v443_v50  ;;  %v440_v26 = vadd.s32 %v439_v13, %v438_v59 }
  0x9d   : > { %v402_v43 = vsel %vm394_vm7, 1, %v1085_v6  ;;  %v303_v44 = vsel %vm295_vm8, 1, %v1085_v6  ;;  %v417_v4 = vadd.s32 %v416_v54, %v415_v47  ;;  %v412_v16 = vadd.s32 %v411_v3, %v410_v53 }
  0x9e   : > { %v312_v48 = vsel %vm311_vm4, %v303_v44, 0  ;;  %v422_v51 = vsel %vm311_vm4, %v402_v43, 0  ;;  %v446_v22 = vrot.slane %v445_v9, 2  ;;  %v441_v39 = vrot.slane %v440_v26, 1 }
  0x9f   : > { %v379_v41 = vpop.permute.xlu1 %378  ;;  %v276_v45 = vpop.permute.xlu0 %275  ;;  %v313_v52 = vrot.slane %v312_v48, 4  ;;  %v423_v62 = vrot.slane %v422_v51, 4  ;;  %v418_v17 = vrot.slane %v417_v4, 2  ;;  %v413_v30 = vrot.slane %v412_v16, 1 }
  0xa0   : > { %vm395_vm9 = vcmp.eq.s32.totalorder %v379_v41, %v1216_v28  ;;  %vm296_vm10 = vcmp.eq.s32.totalorder %v276_v45, %v1216_v28  ;;  %v447_v37 = vadd.s32 %v446_v22, %v445_v9 }
  0xa1   : > { %v403_v49 = vsel %vm395_vm9, 1, %v1085_v6  ;;  %v304_v56 = vsel %vm296_vm10, 1, %v1085_v6  ;;  %v314_v0 = vadd.s32 %v313_v52, %v312_v48  ;;  %v424_v10 = vadd.s32 %v423_v62, %v422_v51 }
  0xa2   : > { %v429_v55 = vsel %vm311_vm4, %v403_v49, 0  ;;  %v319_v60 = vsel %vm311_vm4, %v304_v56, 0  ;;  %v419_v31 = vadd.s32 %v418_v17, %v417_v4  ;;  %v414_v48 = vadd.s32 %v413_v30, %v412_v16 }
  0xa3   : > { %v279_v57 = vpop.permute.xlu0 %278  ;;  %v320_v63 = vrot.slane %v319_v60, 4  ;;  %v430_v1 = vrot.slane %v429_v55, 4  ;;  %v315_v14 = vrot.slane %v314_v0, 2  ;;  %v425_v23 = vrot.slane %v424_v10, 2 }
  0xa4   : > { %v477_v58 = vpop.permute.xlu1 %476  ;;  %vm297_vm11 = vcmp.eq.s32.totalorder %v279_v57, %v1216_v28  ;;  %v420_v44 = vrot.slane %v419_v31, 1  ;;  %v448_v51 = vrot.slane %v447_v37, 1 }
  0xa5   : > { %v305_v2 = vsel %vm297_vm11, 1, %v1085_v6  ;;  %vm497_vm12 = vcmp.eq.s32.totalorder %v477_v58, %v1216_v28  ;;  %v321_v7 = vadd.s32 %v320_v63, %v319_v60  ;;  %v431_v15 = vadd.s32 %v430_v1, %v429_v55 }
  0xa6   : > { %v326_v11 = vsel %vm311_vm4, %v305_v2, 0  ;;  %v505_v12 = vsel %vm497_vm12, 1, %v1085_v6  ;;  %v316_v27 = vadd.s32 %v315_v14, %v314_v0  ;;  %v426_v38 = vadd.s32 %v425_v23, %v424_v10 }
  0xa7   : > { %v282_v5 = vpop.permute.xlu0 %281  ;;  %v322_v19 = vrot.slane %v321_v7, 2  ;;  %v327_v20 = vrot.slane %v326_v11, 4  ;;  %v519_v21 = vsel %vm311_vm4, %v505_v12, 0  ;;  %v432_v29 = vrot.slane %v431_v15, 2 }
  0xa8   : > { %vm298_vm13 = vcmp.eq.s32.totalorder %v282_v5, %v1216_v28  ;;  %v520_v32 = vrot.slane %v519_v21, 4  ;;  %v317_v40 = vrot.slane %v316_v27, 1  ;;  %v427_v52 = vrot.slane %v426_v38, 1 }
  0xa9   : > { %v285_v8 = vpop.permute.xlu1 %284  ;;  %v306_v24 = vsel %vm298_vm13, 1, %v1085_v6  ;;  %v323_v34 = vadd.s32 %v322_v19, %v321_v7  ;;  %v328_v35 = vadd.s32 %v327_v20, %v326_v11  ;;  %v433_v41 = vadd.s32 %v432_v29, %v431_v15 }
  0xaa   : > { %vm299_vm14 = vcmp.eq.s32.totalorder %v285_v8, %v1216_v28  ;;  %v333_v36 = vsel %vm311_vm4, %v306_v24, 0  ;;  %v521_v45 = vadd.s32 %v520_v32, %v519_v21  ;;  %v1259_v55 = vadd.s32 %v441_v39, %v440_v26 }
  0xab   : > { %v291_v18 = vpop.permute.xlu0 %290  ;;  %v307_v42 = vsel %vm299_vm14, 1, %v1085_v6  ;;  %v334_v46 = vrot.slane %v333_v36, 4  ;;  %v324_v49 = vrot.slane %v323_v34, 1  ;;  %v329_v50 = vrot.slane %v328_v35, 2 }
  0xac   : > { %v340_v53 = vsel %vm311_vm4, %v307_v42, 0  ;;  %v318_v56 = vadd.s32 %v317_v40, %v316_v27  ;;  %v434_v57 = vrot.slane %v433_v41, 1  ;;  %v421_v59 = vadd.s32 %v420_v44, %v419_v31 }
  0xad   : > { %v522_v60 = vrot.slane %v521_v45, 2  ;;  %v335_v61 = vadd.s32 %v334_v46, %v333_v36  ;;  %vm301_vm1 = vcmp.eq.s32.totalorder %v291_v18, %v1216_v28  ;;  %v325_v63 = vadd.s32 %v324_v49, %v323_v34 }
  0xae   : > { %v480_v25 = vpop.permute.xlu1 %479  ;;  %v330_v0 = vadd.s32 %v329_v50, %v328_v35  ;;  %v341_v1 = vrot.slane %v340_v53, 4  ;;  %v1264_v3 = vadd.s32 %v448_v51, %v447_v37  ;;  %v1266_v4 = vadd.s32 %v427_v52, %v426_v38 }
  0xaf   : > { %v1251_v33 = vpop.permute.xlu0 %293  ;;  %vm498_vm15 = vcmp.eq.s32.totalorder %v480_v25, %v1216_v28  ;;  %v1269_v7 = vadd.s32 %v414_v48, %v318_v56  ;;  %v1271_v8 = vadd.s32 %v434_v57, %v433_v41  ;;  %v309_v9 = vsel %vm301_vm1, 1, %v1085_v6 }
  0xb0   : > { %v506_v47 = vsel %vm498_vm15, 1, %v1085_v6  ;;  %v523_v11 = vadd.s32 %v522_v60, %v521_v45  ;;  %v336_v12 = vrot.slane %v335_v61, 2  ;;  %v465_v16 = vadd.s32 %v421_v59, %v325_v63 }
  0xb1   : > { %v526_v58 = vsel %vm311_vm4, %v506_v47, 0  ;;  %v331_v17 = vrot.slane %v330_v0, 1  ;;  %v342_v18 = vadd.s32 %v341_v1, %v340_v53  ;;  %v354_v21 = vsel %vm311_vm4, %v309_v9, 0 }
  0xb2   : > { %v527_v5 = vrot.slane %v526_v58, 4  ;;  %vm302_vm3 = vcmp.eq.s32.totalorder %v1251_v33, %v1216_v28  ;;  %v524_v26 = vrot.slane %v523_v11, 1  ;;  %v337_v27 = vadd.s32 %v336_v12, %v335_v61 }
  0xb3   : > { %v288_v43 = vpop.permute.xlu1 %287  ;;  %v343_v31 = vrot.slane %v342_v18, 2  ;;  %v310_v36 = vsel %vm302_vm3, 1, %v1085_v6  ;;  %v355_v44 = vrot.slane %v354_v21, 4  ;;  %vm615_vm12 = vcmask 1041409  }
  0xb4   : > { %vm300_vm0 = vcmp.eq.s32.totalorder %v288_v43, %v1216_v28  ;;  %v474_v54 = vpop.permute.xlu0 %473  ;;  %v528_v22 = vadd.s32 %v527_v5, %v526_v58  ;;  %v332_v43 = vadd.s32 %v331_v17, %v330_v0  ;;  %v525_v46 = vadd.s32 %v524_v26, %v523_v11 }
  0xb5   : > { %v308_v2 = vsel %vm300_vm0, 1, %v1085_v6  ;;  %vm496_vm2 = vcmp.eq.s32.totalorder %v474_v54, %v1216_v28  ;;  %v338_v47 = vrot.slane %v337_v27, 1  ;;  %v361_v50 = vsel %vm311_vm4, %v310_v36, 0 }
  0xb6   : > { %v504_v10 = vsel %vm496_vm2, 1, %v1085_v6  ;;  %v347_v13 = vsel %vm311_vm4, %v308_v2, 0  ;;  %v529_v33 = vrot.slane %v528_v22, 2  ;;  %v344_v54 = vadd.s32 %v343_v31, %v342_v18 }
  0xb7   : > { %v512_v14 = vsel %vm311_vm4, %v504_v10, 0  ;;  %v348_v23 = vrot.slane %v347_v13, 4  ;;  %v356_v60 = vadd.s32 %v355_v44, %v354_v21  ;;  %v569_v63 = vadd.s32 %v525_v46, %v465_v16 }
  0xb8   : > { %v483_v62 = vpop.permute.xlu1 %482  ;;  %v489_v15 = vpop.permute.xlu0 %488  ;;  %v513_v19 = vrot.slane %v512_v14, 4  ;;  %v530_v56 = vadd.s32 %v529_v33, %v528_v22  ;;  %v362_v0 = vrot.slane %v361_v50, 4  ;;  %v345_v12 = vrot.slane %v344_v54, 1 }
  0xb9   : > { %vm499_vm5 = vcmp.eq.s32.totalorder %v483_v62, %v1216_v28  ;;  %vm501_vm6 = vcmp.eq.s32.totalorder %v489_v15, %v1216_v28  ;;  %v349_v39 = vadd.s32 %v348_v23, %v347_v13  ;;  %v466_v17 = vadd.s32 %v1266_v4, %v332_v43 }
  0xba   : > { %v514_v24 = vadd.s32 %v513_v19, %v512_v14  ;;  %v507_v25 = vsel %vm499_vm5, 1, %v1085_v6  ;;  %v509_v30 = vsel %vm501_vm6, 1, %v1085_v6  ;;  %v531_v13 = vrot.slane %v530_v56, 1 }
  0xbb   : > { %v533_v29 = vsel %vm311_vm4, %v507_v25, 0  ;;  %v547_v35 = vsel %vm311_vm4, %v509_v30, 0  ;;  %v350_v57 = vrot.slane %v349_v39, 2  ;;  %v339_v18 = vadd.s32 %v338_v47, %v337_v27 }
  0xbc   : > { %v515_v32 = vrot.slane %v514_v24, 2  ;;  %v534_v34 = vrot.slane %v533_v29, 4  ;;  %v548_v37 = vrot.slane %v547_v35, 4  ;;  %v357_v16 = vrot.slane %v356_v60, 2 }
  0xbd   : > { %v388_v20 = vpop.permute.xlu1 %387  ;;  %v351_v14 = vadd.s32 %v350_v57, %v349_v39  ;;  %v363_v22 = vadd.s32 %v362_v0, %v361_v50  ;;  %v577_v30 = vcvt.s32.f32 %v569_v63  ;;  %v346_v31 = vadd.s32 %v345_v12, %v344_v54 }
  0xbe   : > { %vm398_vm7 = vcmp.eq.s32.totalorder %v388_v20, %v1216_v28  ;;  %v516_v40 = vadd.s32 %v515_v32, %v514_v24  ;;  %v535_v41 = vadd.s32 %v534_v34, %v533_v29  ;;  %v549_v52 = vadd.s32 %v548_v37, %v547_v35 }
  0xbf   : > { %v406_v42 = vsel %vm398_vm7, 1, %v1085_v6  ;;  %v532_v32 = vadd.s32 %v531_v13, %v530_v56  ;;  %v352_v34 = vrot.slane %v351_v14, 1  ;;  %v467_v37 = vadd.s32 %v1271_v8, %v339_v18 }
  0xc0   : > { %v450_v45 = vsel %vm311_vm4, %v406_v42, 0  ;;  %v536_v48 = vrot.slane %v535_v41, 2  ;;  %v517_v51 = vrot.slane %v516_v40, 1  ;;  %v550_v9 = vrot.slane %v549_v52, 2 }
  0xc1   : > { %v451_v49 = vrot.slane %v450_v45, 4  ;;  %v364_v39 = vrot.slane %v363_v22, 2  ;;  %v468_v44 = vadd.s32 %v1259_v55, %v346_v31  ;;  %v353_v47 = vadd.s32 %v352_v34, %v351_v14 }
  0xc2   : > { %v486_v38 = vpop.permute.xlu1 %485  ;;  %v537_v61 = vadd.s32 %v536_v48, %v535_v41  ;;  %v518_v5 = vadd.s32 %v517_v51, %v516_v40  ;;  %v551_v26 = vadd.s32 %v550_v9, %v549_v52  ;;  %vm617_vm13 = vcmask 1042434  }
  0xc3   : > { %vm500_vm8 = vcmp.eq.s32.totalorder %v486_v38, %v1216_v28  ;;  %v452_v1 = vadd.s32 %v451_v49, %v450_v45  ;;  %v358_v38 = vadd.s32 %v357_v16, %v356_v60  ;;  %v570_v45 = vadd.s32 %v532_v32, %v466_v17 }
  0xc4   : > { %v508_v53 = vsel %vm500_vm8, 1, %v1085_v6  ;;  %v538_v19 = vrot.slane %v537_v61, 1  ;;  %v568_v25 = vadd.s32 %v518_v5, %v1269_v7  ;;  %v552_v41 = vrot.slane %v551_v26, 1 }
  0xc5   : > { %v540_v58 = vsel %vm311_vm4, %v508_v53, 0  ;;  %v453_v23 = vrot.slane %v452_v1, 2  ;;  %v365_v54 = vadd.s32 %v364_v39, %v363_v22  ;;  %v359_v55 = vrot.slane %v358_v38, 1 }
  0xc6   : > { %v541_v62 = vrot.slane %v540_v58, 4  ;;  %v539_v35 = vadd.s32 %v538_v19, %v537_v61  ;;  %v576_v7 = vcvt.s32.f32 %v568_v25  ;;  %v553_v57 = vadd.s32 %v552_v41, %v551_v26 }
  0xc7   : > { %v391_v59 = vpop.permute.xlu1 %390  ;;  %v454_v40 = vadd.s32 %v453_v23, %v452_v1  ;;  %v578_v60 = vcvt.s32.f32 %v570_v45  ;;  %v366_v5 = vrot.slane %v365_v54, 1  ;;  %v360_v12 = vadd.s32 %v359_v55, %v358_v38 }
  0xc8   : > { %vm399_vm9 = vcmp.eq.s32.totalorder %v391_v59, %v1216_v28  ;;  %v542_v10 = vadd.s32 %v541_v62, %v540_v58  ;;  %v571_v48 = vadd.s32 %v539_v35, %v467_v37  ;;  %v584_v56 = vpack.c.bf16 %v576_v7, %v576_v7 }
  0xc9   : > { %v407_v2 = vsel %vm399_vm9, 1, %v1085_v6  ;;  %v455_v8 = vrot.slane %v454_v40, 1  ;;  %v585_v59 = vpack.c.bf16 %v577_v30, %v577_v30  ;;  %v586_v13 = vpack.c.bf16 %v578_v60, %v578_v60 }
  0xca   : > { %v457_v11 = vsel %vm311_vm4, %v407_v2, 0  ;;  %v543_v20 = vrot.slane %v542_v10, 2  ;;  %v579_v62 = vcvt.s32.f32 %v571_v48  ;;  %v607_v9 = vunpack.c.l.b16 %v584_v56 }
  0xcb   : > { %v458_v15 = vrot.slane %v457_v11, 4  ;;  %v456_v1 = vadd.s32 %v455_v8, %v454_v40  ;;  %v367_v16 = vadd.s32 %v366_v5, %v365_v54  ;;  %v609_v25 = vunpack.c.l.b16 %v586_v13 }
  0xcc   : > { %v492_v21 = vpop.permute.xlu1 %491  ;;  %v544_v29 = vadd.s32 %v543_v20, %v542_v10  ;;  %v587_v17 = vpack.c.bf16 %v579_v62, %v579_v62  ;;  %vm619_vm14 = vcmask 1043459   ;;  %vm621_vm15 = vcmask 1044484  }
  0xcd   : > { %v459_v24 = vadd.s32 %v458_v15, %v457_v11  ;;  %vm502_vm10 = vcmp.eq.s32.totalorder %v492_v21, %v1216_v28  ;;  %v608_v15 = vunpack.c.l.b16 %v585_v59  ;;  %vm623_vm0 = vcmask 1045509  }
  0xce   : > { %v545_v4 = vrot.slane %v544_v29, 1  ;;  %v510_v33 = vsel %vm502_vm10, 1, %v1085_v6  ;;  %vm625_vm1 = vcmask 1046534   ;;  %vm627_vm2 = vcmask 1047559  }
  0xcf   : > { %v460_v27 = vrot.slane %v459_v24, 2  ;;  %v554_v43 = vsel %vm311_vm4, %v510_v33, 0  ;;  %v616_v22 = vsel %vm615_vm12, %v608_v15, %v607_v9 }
  0xd0   : > { %v495_v36 = vpop.permute.xlu1 %494  ;;  %v546_v42 = vadd.s32 %v545_v4, %v544_v29  ;;  %v555_v46 = vrot.slane %v554_v43, 4  ;;  %v610_v29 = vunpack.c.l.b16 %v587_v17  ;;  %v618_v32 = vsel %vm617_vm13, %v609_v25, %v616_v22 }
  0xd1   : > { %vm503_vm11 = vcmp.eq.s32.totalorder %v495_v36, %v1216_v28  ;;  %v461_v49 = vadd.s32 %v460_v27, %v459_v24  ;;  %v469_v28 = vadd.s32 %v1264_v3, %v353_v47  ;;  %v470_v3 = vadd.s32 %v456_v1, %v360_v12 }
  0xd2   : > { %v511_v50 = vsel %vm503_vm11, 1, %v1085_v6  ;;  %v572_v51 = vadd.s32 %v546_v42, %v468_v44  ;;  %v556_v52 = vadd.s32 %v555_v46, %v554_v43  ;;  %v620_v36 = vsel %vm619_vm14, %v610_v29, %v618_v32 }
  0xd3   : > { %v561_v53 = vsel %vm311_vm4, %v511_v50, 0  ;;  %v462_v63 = vrot.slane %v461_v49, 1  ;;  %v573_v10 = vadd.s32 %v553_v57, %v469_v28 }
  0xd4   : > { %v562_v58 = vrot.slane %v561_v53, 4  ;;  %v557_v61 = vrot.slane %v556_v52, 2  ;;  %v580_v6 = vcvt.s32.f32 %v572_v51  ;;  %v902_v51 = vld [vmem:[%s1356_s4] ss:$0 sm:$0xff] }
  0xd5   : > { %v463_v18 = vadd.s32 %v462_v63, %v461_v49  ;;  %v581_v23 = vcvt.s32.f32 %v573_v10 }
  0xd6   : > { %v563_v0 = vadd.s32 %v562_v58, %v561_v53  ;;  %v558_v2 = vadd.s32 %v557_v61, %v556_v52  ;;  %v588_v20 = vpack.c.bf16 %v580_v6, %v580_v6 }
  0xd7   : > { %v471_v30 = vadd.s32 %v463_v18, %v367_v16  ;;  %v589_v4 = vpack.c.bf16 %v581_v23, %v581_v23 }
  0xd8   : > { %v564_v11 = vrot.slane %v563_v0, 2  ;;  %v559_v14 = vrot.slane %v558_v2, 1  ;;  %v611_v34 = vunpack.c.l.b16 %v588_v20 }
  0xd9   : > { %v612_v40 = vunpack.c.l.b16 %v589_v4 }
  0xda   : > { %v565_v19 = vadd.s32 %v564_v11, %v563_v0  ;;  %v560_v21 = vadd.s32 %v559_v14, %v558_v2  ;;  %v622_v39 = vsel %vm621_vm15, %v611_v34, %v620_v36 }
  0xdb   : > { %v624_v42 = vsel %vm623_vm0, %v612_v40, %v622_v39 }
  0xdc   : > { %v566_v24 = vrot.slane %v565_v19, 1  ;;  %v574_v26 = vadd.s32 %v560_v21, %v470_v3 }
  0xde   : > { %v567_v31 = vadd.s32 %v566_v24, %v565_v19  ;;  %v582_v35 = vcvt.s32.f32 %v574_v26 }
  0xe0   : > { %v575_v27 = vadd.s32 %v567_v31, %v471_v30  ;;  %v590_v33 = vpack.c.bf16 %v582_v35, %v582_v35 }
  0xe2   : > { %v583_v37 = vcvt.s32.f32 %v575_v27  ;;  %v613_v38 = vunpack.c.l.b16 %v590_v33 }
  0xe4   : > { %v591_v7 = vpack.c.bf16 %v583_v37, %v583_v37  ;;  %v626_v43 = vsel %vm625_vm1, %v613_v38, %v624_v42 }
  0xe6   : > { %v614_v41 = vunpack.c.l.b16 %v591_v7 }
  0xe8   : > { %v628_v44 = vsel %vm627_vm2, %v614_v41, %v626_v43 }
  0xe9   : > { %v629_v45 = vpack.c.b16 %v628_v44, %v628_v44 }
  0xeb   : > { %930 = vmatmul.mubr.msk.bf16.vlgmr.msra.gmra.mxu0 %vm311_vm4, %v629_v45 }
  0xf5   : > { %v780_v46 = vpop.f32.mrf.mxu1 }
  0xf7   : > { %v951_v47 = vpop.f32.mrf.mxu1 }
  0xf9   : > { %v783_v48 = vpop.f32.mrf.mxu1 }
  0xfb   : > { %v952_v49 = vpop.f32.mrf.mxu1 }
 0x1ab   : > { %v692_v50 = vpop.f32.mrf.mxu0 }
 0x1ac   : > { %v781_v8 = vadd.f32 %v780_v46, %v692_v50 }
 0x1ad   : > { %v931_v52 = vpop.f32.mrf.mxu0 }
 0x1ae   : > { %v786_v53 = vmul.f32 0.125, %v781_v8 }
 0x1af   : > { %v695_v54 = vpop.f32.mrf.mxu0 }
 0x1b0   : > { %v794_v56 = vadd.f32 %v902_v51, %v786_v53 }
 0x1b1   : > { %v932_v57 = vpop.f32.mrf.mxu0 }
 0x1b2   : > { %795 = vst [vmem:[%s231_s12] sm:$0xff] %v794_v56 }
 0x1b3   : > { %1035 = shalt.err (!%p1032_p4)
}
 0x1b4   : > { %s1036_s30 = scalar_lea.hbm %s1317_s16, 128  ;;  %s1040_s8 = scalar_lea.hbm %s1357_s5, 256 }
 0x1b5   : > { %p1037_p7 = scmp.ne.s32.totalorder %s1317_s16, %s1036_s30  ;;  %p1041_p10 = scmp.lt.s32.totalorder %s1317_s16, %s1357_s5 }
 0x1b6   : > { %p1042_p11 = scmp.lt.s32.totalorder %s1040_s8, %s1036_s30 }
 0x1b7   : > { %p1038_p8 = pnand %p1037_p7, %p1158_p5 }
 0x1b8   : > { %p1043_p12 = por %p1042_p11, %p1041_p10 }
 0x1b9   : > { %p1039_p9 = pneg %p1038_p8 }
 0x1bb   : > { %p1044_p13 = pnand %p1043_p12, %p1039_p9 }
 0x1bd   : > { %1047 = shalt.err (!%p1044_p13)
}
 0x1be   : > { %953 = dma.vmem_to_hbm [thread:$0]  (%p1158_p5), %s811_s13, 128, %s1317_s16, %s797_s17  }
 0x1bf PF: > { %p959_p0 = scmp.ge.s32.totalorder %s1082_s21, 2  ;;  %s822_s11 = sand.u32 1, %s1070_s18  }
 0x1c0   : > { %s823_s12 = scalar_lea.sflag [#allocation3], %s822_s11 }
 0x1c1   : > { %p956_p1 = pnand %p959_p0, %p1162_p6 }
 0x1c3   : > { %p957_p2 = pneg %p956_p1 }
 0x1c5   : > { %1065 = dma.done.wait (%p957_p2), %s823_s12, 128  }
 0x1c6   : > { %1067 = vsyncadd (%p957_p2), %s823_s12, 4294967168  ;;  %p15_p3 = scmp.ge.s32.totalorder %s1145_s24, 4   ;;  %s1360_s18 = smov %s1074_s19 }
 0x1c7   : > { %s1361_s19 = smov %s1078_s20  ;;  %s1362_s20 = smov %s1156_s27 }
 0x1c8   : > { %s1363_s21 = smov %s1145_s24  ;;  %17 = sbr.rel (!%p15_p3) target bundleno = 3 (0x3), region = 78 }
 0x1cd   :  { %828 = vsyncpa [#allocation3], 1 }
 0x1ce   :  { %830 = vsyncpa [#allocation3 + $0x1], 1 }

</bundles_post_ra>
